<compile_context>
chip_gen: v6e
topology: v6e:2x2x1
jax: 0.10.0
libtpu: 0.0.40
codegen_flags: <defaults>
</compile_context>

<pallas_src>
import functools
import math

import jax
import jax.numpy as jnp
from jax.experimental import pallas as pl
from jax.experimental.pallas import tpu as pltpu


def _round_up(x, m):
    return ((x + m - 1) // m) * m


def _pad2d(a, rows, cols):
    return jnp.pad(a, ((0, rows - a.shape[0]), (0, cols - a.shape[1])))


# ---------------------------------------------------------------------------
# Kernel 1: per-layer node transform   h = x @ W ,  s = h @ att^T   (hoisted)
# ---------------------------------------------------------------------------
def _transform_kernel(x_ref, w_ref, att_t_ref, h_ref, s_ref):
    # x_ref / w_ref arrive as bf16 (cast in wrapper -> half DMA bytes).
    h = jnp.dot(x_ref[...], w_ref[...],
                preferred_element_type=jnp.float32)           # (TI, Dp) f32
    s_ref[...] = jnp.dot(h, att_t_ref[...],
                         preferred_element_type=jnp.float32)  # (TI, 2) f32
    h_ref[...] = h.astype(jnp.bfloat16)


# ---------------------------------------------------------------------------
# Kernel 2: tiled masked-softmax attention + aggregation (online softmax)
# ---------------------------------------------------------------------------
def _gat_attn_kernel(adj_ref, sdst_ref, ssrc_ref, h_ref, bias_ref, out_ref,
                     m_ref, l_ref, acc_ref, *, apply_relu):
    j = pl.program_id(1)

    @pl.when(j == 0)
    def _():
        m_ref[...] = jnp.full_like(m_ref, -1e30)
        l_ref[...] = jnp.zeros_like(l_ref)
        acc_ref[...] = jnp.zeros_like(acc_ref)

    mask = adj_ref[...] != 0                                   # (TI,TJ) bool (int8 stream)

    # e[i,j] = LeakyReLU(s_dst[i] + s_src[j]); s_src is lane-dense (1, TJ).
    e = sdst_ref[...] + ssrc_ref[...]                          # (TI,1)+(1,TJ) -> (TI,TJ)
    e = jnp.where(e > 0, e, jnp.float32(0.2) * e)
    e = jnp.where(mask, e, jnp.float32(-1e30))

    m_prev = m_ref[...]
    m_new = jnp.maximum(m_prev, jnp.max(e, axis=-1, keepdims=True))
    scale = jnp.exp(m_prev - m_new)
    p = jnp.where(mask, jnp.exp(e - m_new), jnp.float32(0.0))  # (TI,TJ) f32

    l_ref[...] = scale * l_ref[...] + jnp.sum(p, axis=-1, keepdims=True)
    acc_ref[...] = scale * acc_ref[...] + jnp.dot(
        p.astype(jnp.bfloat16), h_ref[...],                    # h stored bf16
        preferred_element_type=jnp.float32)
    m_ref[...] = m_new

    @pl.when(j == pl.num_programs(1) - 1)
    def _():
        inv = pl.reciprocal(jnp.maximum(l_ref[...], jnp.float32(1e-20)),
                            approx=True)
        out = acc_ref[...] * inv + bias_ref[...]
        if apply_relu:
            out = jnp.maximum(out, jnp.float32(0.0))
        out_ref[...] = out.astype(out_ref.dtype)


# ---------------------------------------------------------------------------
# One GAT layer (padded shapes): prologue transform + tiled attention
# ---------------------------------------------------------------------------
def gat_layer(x_pad, adj_pad, w_pad, att_pad, bias_pad, *, tile_i, tile_j,
              apply_relu):
    n_pad, d_in = x_pad.shape
    d_out = w_pad.shape[1]
    assert n_pad % tile_i == 0 and n_pad % tile_j == 0
    num_i = n_pad // tile_i
    num_j = n_pad // tile_j

    x_bf16 = x_pad.astype(jnp.bfloat16)
    w_bf16 = w_pad.astype(jnp.bfloat16)
    att_t = jnp.transpose(att_pad).astype(jnp.float32)         # (Dp, 2)

    h, s = pl.pallas_call(
        _transform_kernel,
        out_shape=(jax.ShapeDtypeStruct((n_pad, d_out), jnp.bfloat16),
                   jax.ShapeDtypeStruct((n_pad, 2), jnp.float32)),
        grid=(num_i,),
        in_specs=[pl.BlockSpec((tile_i, d_in), lambda i: (i, 0)),
                  pl.BlockSpec((d_in, d_out), lambda i: (0, 0)),
                  pl.BlockSpec((d_out, 2), lambda i: (0, 0))],
        out_specs=(pl.BlockSpec((tile_i, d_out), lambda i: (i, 0)),
                   pl.BlockSpec((tile_i, 2), lambda i: (i, 0))),
        compiler_params=pltpu.CompilerParams(dimension_semantics=("parallel",)),
    )(x_bf16, w_bf16, att_t)

    # Lane-dense source scores (1, N_pad); per-target scores (N_pad, 1).
    s_src_row = jnp.transpose(s[:, 0:1])                       # (1, N_pad)
    s_dst = s[:, 1:2]                                          # (N_pad, 1)

    kernel = functools.partial(_gat_attn_kernel, apply_relu=apply_relu)
    out = pl.pallas_call(
        kernel,
        out_shape=jax.ShapeDtypeStruct((n_pad, d_out), jnp.float32),
        grid=(num_i, num_j),
        in_specs=[pl.BlockSpec((tile_i, tile_j), lambda i, j: (i, j)),   # adj (int8)
                  pl.BlockSpec((tile_i, 1), lambda i, j: (i, 0)),        # s_dst
                  pl.BlockSpec((1, tile_j), lambda i, j: (0, j)),        # s_src (row)
                  pl.BlockSpec((tile_j, d_out), lambda i, j: (j, 0)),    # h (bf16)
                  pl.BlockSpec((1, d_out), lambda i, j: (0, 0))],        # bias
        out_specs=pl.BlockSpec((tile_i, d_out), lambda i, j: (i, 0)),
        scratch_shapes=[pltpu.VMEM((tile_i, 1), jnp.float32),            # running max
                        pltpu.VMEM((tile_i, 1), jnp.float32),            # running denom
                        pltpu.VMEM((tile_i, d_out), jnp.float32)],       # accumulator
        compiler_params=pltpu.CompilerParams(
            dimension_semantics=("parallel", "arbitrary")),
    )(adj_pad, s_dst, s_src_row, h, bias_pad)
    return out


# ---------------------------------------------------------------------------
# Glue: dense int8 adjacency (self-loops added, GATConv default), padding
# ---------------------------------------------------------------------------
def edge_index_to_dense_adj(edge_index, num_nodes, num_nodes_pad):
    """adj[dst, src] = 1 for each edge; self-loops added. int8, padded with 0."""
    src = edge_index[0]
    dst = edge_index[1]
    adj = jnp.zeros((num_nodes_pad, num_nodes_pad), jnp.int8)
    adj = adj.at[dst, src].set(1)
    diag = jnp.arange(num_nodes)
    adj = adj.at[diag, diag].set(1)
    return adj


def init_params(key, input_dim, hidden_dim, output_dim):
    k1, k2, k3, k4 = jax.random.split(key, 4)

    def glorot(k, shape):
        fan_in, fan_out = shape[0], shape[-1]
        scale = jnp.sqrt(6.0 / (fan_in + fan_out))
        return jax.random.uniform(k, shape, jnp.float32, -scale, scale)

    return {
        "w1": glorot(k1, (input_dim, hidden_dim)),
        "att1": glorot(k2, (2, hidden_dim)),   # row 0 = a_src, row 1 = a_dst
        "b1": jnp.zeros((1, hidden_dim), jnp.float32),
        "w2": glorot(k3, (hidden_dim, output_dim)),
        "att2": glorot(k4, (2, output_dim)),
        "b2": jnp.zeros((1, output_dim), jnp.float32),
    }


def order_rider_gnn(edge_index, node_features, params, *, tile_i=128, tile_j=128):
    n, d_in = node_features.shape
    hidden = params["w1"].shape[1]
    out_dim = params["w2"].shape[1]

    n_pad = _round_up(n, math.lcm(tile_i, tile_j))
    d_in_p = _round_up(d_in, 128)
    hid_p = _round_up(hidden, 128)
    out_p = _round_up(out_dim, 128)

    adj = edge_index_to_dense_adj(edge_index, n, n_pad)
    x = _pad2d(node_features, n_pad, d_in_p)

    w1 = _pad2d(params["w1"], d_in_p, hid_p)
    a1 = _pad2d(params["att1"], 2, hid_p)
    b1 = _pad2d(params["b1"], 1, hid_p)
    w2 = _pad2d(params["w2"], hid_p, out_p)
    a2 = _pad2d(params["att2"], 2, out_p)
    b2 = _pad2d(params["b2"], 1, out_p)

    x = gat_layer(x, adj, w1, a1, b1, tile_i=tile_i, tile_j=tile_j,
                  apply_relu=True)                 # conv1 + F.relu (fused)
    x = gat_layer(x, adj, w2, a2, b2, tile_i=tile_i, tile_j=tile_j,
                  apply_relu=False)                # conv2
    return x[:n, :out_dim]


# ---------------------------------------------------------------------------
# Pure-JAX reference (mirrors the kernel's bf16 MXU operands, f32 accumulation)
# ---------------------------------------------------------------------------
def _gat_reference(x, adj_f, w, att, b, apply_relu):
    h = jnp.dot(x.astype(jnp.bfloat16), w.astype(jnp.bfloat16),
                preferred_element_type=jnp.float32)
    s = jnp.dot(h, att.T, preferred_element_type=jnp.float32)   # (N, 2)
    e = s[:, 1:2] + s[:, 0:1].T
    e = jnp.where(e > 0, e, 0.2 * e)
    e = jnp.where(adj_f > 0, e, -1e30)
    m = jnp.max(e, axis=-1, keepdims=True)
    p = jnp.where(adj_f > 0, jnp.exp(e - m), 0.0)
    denom = jnp.sum(p, axis=-1, keepdims=True)
    agg = jnp.dot(p.astype(jnp.bfloat16), h.astype(jnp.bfloat16),
                  preferred_element_type=jnp.float32)
    out = agg / jnp.maximum(denom, 1e-20) + b
    if apply_relu:
        out = jnp.maximum(out, 0.0)
    return out


def order_rider_gnn_reference(edge_index, node_features, params):
    n = node_features.shape[0]
    adj = edge_index_to_dense_adj(edge_index, n, n).astype(jnp.float32)
    x = _gat_reference(node_features, adj, params["w1"], params["att1"],
                       params["b1"], apply_relu=True)
    x = _gat_reference(x, adj, params["w2"], params["att2"],
                       params["b2"], apply_relu=False)
    return x


if __name__ == "__main__":
    N = 200          # nodes  (padded to 256 -> 2x2 grid of 128x128 tiles)
    INPUT_DIM = 16
    HIDDEN_DIM = 32
    OUTPUT_DIM = 8

    key = jax.random.PRNGKey(0)
    k_feat, k_params = jax.random.split(key)

    # deterministic graph: bidirectional ring over N nodes -> edge_index (2, 2N)
    ring_src = jnp.arange(N, dtype=jnp.int32)
    ring_dst = (ring_src + 1) % N
    edge_index = jnp.stack([
        jnp.concatenate([ring_src, ring_dst]),
        jnp.concatenate([ring_dst, ring_src]),
    ])

    node_features = jax.random.normal(k_feat, (N, INPUT_DIM), jnp.float32)
    params = init_params(k_params, INPUT_DIM, HIDDEN_DIM, OUTPUT_DIM)

    out = order_rider_gnn(edge_index, node_features, params)
    out = jax.block_until_ready(out)

    assert out.shape == (N, OUTPUT_DIM)
    assert bool(jnp.all(jnp.isfinite(out)))

    ref = order_rider_gnn_reference(edge_index, node_features, params)
    ref = jax.block_until_ready(ref)
    max_err = float(jnp.max(jnp.abs(out - ref)))
    assert max_err < 1e-1, f"kernel/reference mismatch: max_err={max_err}"

    print("KERNEL_OK")
</pallas_src>

<mosaic_0001>
module attributes {stable_mosaic.version = 11 : i64} {
  func.func @_transform_kernel(%arg0: i32, %arg1: memref<128x128xbf16, #tpu.memory_space<vmem>>, %arg2: memref<128x128xbf16, #tpu.memory_space<vmem>>, %arg3: memref<128x2xf32, #tpu.memory_space<vmem>>, %arg4: memref<128x128xbf16, #tpu.memory_space<vmem>>, %arg5: memref<128x2xf32, #tpu.memory_space<vmem>>) attributes {dimension_semantics = [#tpu.dimension_semantics<parallel>], iteration_bounds = array<i64: 2>, scalar_prefetch = 0 : i64, scratch_operands = 0 : i64, tpu.core_type = #tpu.core_type<tc>, window_params = [{transform_indices = @transform_0, window_bounds = array<i64: 128, 128>}, {pipeline_mode = #tpu.pipeline_mode<synchronous>, transform_indices = @transform_1, window_bounds = array<i64: 128, 128>}, {pipeline_mode = #tpu.pipeline_mode<synchronous>, transform_indices = @transform_2, window_bounds = array<i64: 128, 2>}, {transform_indices = @transform_3, window_bounds = array<i64: 128, 128>}, {transform_indices = @transform_4, window_bounds = array<i64: 128, 2>}]} {
    %c0 = arith.constant 0 : index
    %c0_0 = arith.constant 0 : index
    %0 = vector.load %arg1[%c0, %c0_0] : memref<128x128xbf16, #tpu.memory_space<vmem>>, vector<128x128xbf16>
    %c0_1 = arith.constant 0 : index
    %c0_2 = arith.constant 0 : index
    %1 = vector.load %arg2[%c0_1, %c0_2] : memref<128x128xbf16, #tpu.memory_space<vmem>>, vector<128x128xbf16>
    %cst = arith.constant dense<0.000000e+00> : vector<128x128xf32>
    %2 = tpu.matmul %0, %1, %cst {dimension_numbers = #tpu.dot_dimension_numbers<[1], [0], [0], [1], [0, 0, 1, 1], [], []>} : vector<128x128xbf16>, vector<128x128xbf16>, vector<128x128xf32> -> vector<128x128xf32>
    %c0_3 = arith.constant 0 : index
    %c0_4 = arith.constant 0 : index
    %3 = vector.load %arg3[%c0_3, %c0_4] : memref<128x2xf32, #tpu.memory_space<vmem>>, vector<128x2xf32>
    %cst_5 = arith.constant dense<0.000000e+00> : vector<128x2xf32>
    %4 = tpu.matmul %2, %3, %cst_5 {dimension_numbers = #tpu.dot_dimension_numbers<[1], [0], [0], [1], [0, 0, 1, 1], [], []>} : vector<128x128xf32>, vector<128x2xf32>, vector<128x2xf32> -> vector<128x2xf32>
    %c0_6 = arith.constant 0 : index
    %c0_7 = arith.constant 0 : index
    %5 = vector.load %arg5[%c0_6, %c0_7] : memref<128x2xf32, #tpu.memory_space<vmem>>, vector<128x2xf32>
    tpu.vector_store %arg5[%c0_6, %c0_7], %4 {strides = array<i32>} : memref<128x2xf32, #tpu.memory_space<vmem>>, vector<128x2xf32>,
    %6 = arith.truncf %2 : vector<128x128xf32> to vector<128x128xbf16>
    %c0_8 = arith.constant 0 : index
    %c0_9 = arith.constant 0 : index
    %7 = vector.load %arg4[%c0_8, %c0_9] : memref<128x128xbf16, #tpu.memory_space<vmem>>, vector<128x128xbf16>
    tpu.vector_store %arg4[%c0_8, %c0_9], %6 {strides = array<i32>} : memref<128x128xbf16, #tpu.memory_space<vmem>>, vector<128x128xbf16>,
    return
  }
  func.func @transform_0(%arg0: i32) -> (i32, i32) {
    %c0_i32 = arith.constant 0 : i32
    %c0_i32_0 = arith.constant 0 : i32
    return %arg0, %c0_i32 : i32, i32
  }
  func.func @transform_1(%arg0: i32) -> (i32, i32) {
    %c0_i32 = arith.constant 0 : i32
    %c0_i32_0 = arith.constant 0 : i32
    %c0_i32_1 = arith.constant 0 : i32
    return %c0_i32, %c0_i32_0 : i32, i32
  }
  func.func @transform_2(%arg0: i32) -> (i32, i32) {
    %c0_i32 = arith.constant 0 : i32
    %c0_i32_0 = arith.constant 0 : i32
    %c0_i32_1 = arith.constant 0 : i32
    return %c0_i32, %c0_i32_0 : i32, i32
  }
  func.func @transform_3(%arg0: i32) -> (i32, i32) {
    %c0_i32 = arith.constant 0 : i32
    %c0_i32_0 = arith.constant 0 : i32
    return %arg0, %c0_i32 : i32, i32
  }
  func.func @transform_4(%arg0: i32) -> (i32, i32) {
    %c0_i32 = arith.constant 0 : i32
    %c0_i32_0 = arith.constant 0 : i32
    return %arg0, %c0_i32 : i32, i32
  }
}

</mosaic_0001>

<bundles_post_ra>
// kernel: tpu_custom_call.1
= control target key start
LH: loop header
LB: loop body
LE: loop exit
PB: predicated region body
PF: predicated region fallthrough
CT: control target
= control target key end

     0   :  { %10 = vsyncpa [#allocation3], 0  ;;  %s1508_s0 = inlined_call_operand.vmem [shape: bf16[256,128], index: 0, kind: input, shape index: {}]   ;;  %s1509_s1 = inlined_call_operand.hbm [shape: bf16[128,128], index: 1, kind: input, shape index: {}]   ;;  %s1510_s2 = inlined_call_operand.vmem [shape: f32[128,2], index: 2, kind: input, shape index: {}]   ;;  %s1511_s3 = inlined_call_operand.hbm [shape: bf16[256,128], index: 3, kind: output, shape index: {0}]   ;;  %s1512_s4 = inlined_call_operand.vmem [shape: f32[256,2], index: 4, kind: output, shape index: {1}]  }
   0x1   :  { %11 = vsyncpa [#allocation4], 0 }
   0x2   :  { %13 = vsyncpa [#allocation4 + $0x1], 0  ;;  %s1275_s15 = smov 0   ;;  %s1277_s16 = smov 0  }
   0x3   :  { %s1279_s17 = smov 0   ;;  %s1281_s18 = smov 0  }
   0x4 LB: > { %s1296_s19 = sadd.s32 4294967295, %s1242_s18   ;;  %s834_s20 = sadd.s32 4294967294, %s1242_s18   ;;  %s1242_s18 = sphi %s1281_s18, %s1520_s18   ;;  %s1238_s17 = sphi %s1279_s17, %s1519_s17   ;;  %s1234_s16 = sphi %s1277_s16, %s1518_s16   ;;  %s1230_s15 = sphi %s1275_s15, %s1517_s15  }
   0x5   : > { %s1300_s21 = sadd.s32 1, %s1242_s18   ;;  %s94_s22 = sadd.s32 1, %s1238_s17 }
   0x6   : > { %s91_s23 = ssub.s32 %s1242_s18, %s1300_s21  ;;  %p104_p0 = scmp.ne.s32.totalorder %s1238_s17, %s1234_s16 }
   0x7   : > { %p92_p1 = scmp.eq.s32.totalorder %s91_s23, 0  ;;  %p105_p2 = scmp.eq.s32.totalorder %s1296_s19, 1 }
   0x8   : > { %p110_p3 = scmp.ne.s32.totalorder %s1234_s16, %s1230_s15  ;;  %p111_p4 = scmp.eq.s32.totalorder %s834_s20, 1 }
   0x9   : > { %s1311_s24 = scalar_select %p92_p1, %s1238_s17, %s94_s22  }
   0xa   : > { %p1313_p5 = por %p105_p2, %p104_p0  ;;  %p1317_p6 = por %p111_p4, %p110_p3 }
   0xb   : > { %p835_p7 = scmp.ge.s32.totalorder %s1242_s18, 1  ;;  %p144_p8 = scmp.lt.s32.totalorder %s1242_s18, 3 }
   0xc   : > { %s1514_s26 = scalar_select %p1317_p6, 1, 0 }
   0xd   : > { %p1096_p9 = scmp.eq.s32.totalorder %s1296_s19, 0  ;;  %p1324_p10 = pnand %p835_p7, %p144_p8 }
   0xe   : > { %s1244_s28 = smov [#allocation2]  }
   0xf   : > { %s156_s29 = sshll.u32 %s1244_s28, 4  ;;  %p1088_p11 = pneg %p1324_p10  ;;  %s157_s29 = int_to_ptr.vmem [resolvable:$true] %s156_s29 }
  0x10   : > { %s1163_s30 = scalar_lea.vmem %s157_s29, 1024  ;;  %p1171_p3 = scmp.lt.s32.totalorder %s157_s29, %s157_s29 }
  0x11   : > { %p1089_p12 = pnand %p1096_p9, %p1088_p11  ;;  %p1164_p0 = scmp.ne.s32.totalorder %s157_s29, %s1163_s30 }
  0x12   : > { %p1172_p4 = scmp.lt.s32.totalorder %s1163_s30, %s1163_s30 }
  0x13   : > { %p1154_p13 = pneg %p1089_p12 }
  0x14   : > { %p1173_p6 = por %p1172_p4, %p1171_p3 }
  0x15   : > { %p1166_p1 = pnand %p1164_p0, %p1154_p13 }
  0x17   : > { %p1167_p2 = pneg %p1166_p1 }
  0x19   : > { %p1174_p7 = pnand %p1173_p6, %p1167_p2 }
  0x1b   : > { %1177 = shalt.err (!%p1174_p7)
}
  0x1c   : > { %s1245_s5 = smov 64   ;;  %s1246_s6 = smov 4  }
  0x1d   : > { %1091 = dma.hbm_to_vmem [thread:$0]  (!%p1089_p12), %s1509_s1, 1024, %s157_s29, [#allocation3], %s1245_s5, %s1245_s5, %s1246_s6  }
  0x1e   : > { %184 = sbr.rel (%p1324_p10) target bundleno = 492 (0x1ec), region = 32 }
  0x23   : > { %1221 = dma.done.wait (%p1096_p9), [#allocation3], 1024  }
  0x24   : > { %1223 = vsyncadd (%p1096_p9), [#allocation3], 4294966272  ;;  %s841_s9 = sshll.u32 %s1296_s19, 4  ;;  %v1136_v0 = vld [vmem:[#allocation2 + $0x38] sm:$0xff]   ;;  %v1137_v1 = vld [vmem:[#allocation2 + $0x30] sm:$0xff]   ;;  %s898_s28 = sshll.u32 %s1296_s19, 10 }
  0x25   : > { %p216_p8 = scmp.lt.s32.totalorder %s841_s9, 31  ;;  %994 = vmatprep.subr.bf16.mxu0 %v1136_v0  ;;  %v1138_v2 = vld [vmem:[#allocation2 + $0x28] sm:$0xff]   ;;  %v1139_v3 = vld [vmem:[#allocation2 + $0x20] sm:$0xff]   ;;  %v1140_v5 = vld [vmem:[#allocation2 + $0x18] sm:$0xff]   ;;  %s1426_s5 = scalar_lea.hbm %s1511_s3, %s898_s28 }
  0x26   : > { %995 = vmatpush3.bf16.msra.mxu0 %v1136_v0  ;;  %v1141_v6 = vld [vmem:[#allocation2 + $0x10] sm:$0xff]   ;;  %v469_v7 = vld [vmem:[%s1510_s2 + $0x78] sm:$0xff]  ;;  %v467_v9 = vld [vmem:[%s1510_s2 + $0x68] sm:$0xff]  ;;  %s1247_s8 = smov [#allocation5]  }
  0x27   : > { %s1522_s9 = smov (!%p216_p8, %s841_s9), 31  ;;  %996 = vmatprep.subr.bf16.mxu0 %v1137_v1  ;;  %v468_v8 = vld [vmem:[%s1510_s2 + $0x70] sm:$0xff]  ;;  %1026 = vmatprep.subr.mxu1 %v469_v7  ;;  %v1142_v10 = vld [vmem:[#allocation2 + $0x8] sm:$0xff]   ;;  %v466_v11 = vld [vmem:[%s1510_s2 + $0x60] sm:$0xff] }
  0x28   : > { %s842_s10 = sshll.u32 %s1522_s9, 2  ;;  %1027 = vmatpush3.msra.mxu1 %v469_v7  ;;  %v465_v12 = vld [vmem:[%s1510_s2 + $0x58] sm:$0xff]  ;;  %v1143_v13 = vld [vmem:[#allocation2] sm:$0xff]   ;;  %v464_v14 = vld [vmem:[%s1510_s2 + $0x50] sm:$0xff] }
  0x29   : > { %s1348_s13 = scalar_lea.vmem %s1508_s0, %s842_s10  ;;  %1028 = vmatprep.subr.mxu1 %v468_v8  ;;  %v463_v15 = vld [vmem:[%s1510_s2 + $0x48] sm:$0xff]  ;;  %v462_v16 = vld [vmem:[%s1510_s2 + $0x40] sm:$0xff]  ;;  %v461_v18 = vld [vmem:[%s1510_s2 + $0x38] sm:$0xff]  ;;  %s1182_s10 = sshll.u32 %s1247_s8, 4  ;;  %s1183_s10 = int_to_ptr.vmem [resolvable:$false] %s1182_s10 }
  0x2a   : > { %997 = vmatpush3.bf16.msra.mxu0 %v1137_v1  ;;  %v1144_v4 = vld [vmem:[%s1348_s13] sm:$0xff]   ;;  %1029 = vmatpush3.msra.mxu1 %v468_v8  ;;  %v1145_v17 = vld [vmem:[%s1348_s13 + $0x8] sm:$0xff]   ;;  %v1146_v19 = vld [vmem:[%s1348_s13 + $0x10] sm:$0xff]   ;;  %s1184_s11 = scalar_lea.vmem %s1183_s10, 2048 }
  0x2b   : > { %998 = vmatprep.subr.bf16.mxu0 %v1138_v2  ;;  %1010 = vmatprep.mubr.bf16.mxu0 %v1144_v4  ;;  %v460_v20 = vld [vmem:[%s1510_s2 + $0x30] sm:$0xff]  ;;  %v459_v21 = vld [vmem:[%s1510_s2 + $0x28] sm:$0xff]  ;;  %v458_v22 = vld [vmem:[%s1510_s2 + $0x20] sm:$0xff] }
  0x2c   : > { %1030 = vmatprep.subr.mxu1 %v467_v9  ;;  %v1147_v23 = vld [vmem:[%s1348_s13 + $0x18] sm:$0xff]   ;;  %v1148_v25 = vld [vmem:[%s1348_s13 + $0x20] sm:$0xff]   ;;  %v1149_v26 = vld [vmem:[%s1348_s13 + $0x28] sm:$0xff]  }
  0x2d   : > { %1031 = vmatpush3.msra.mxu1 %v467_v9  ;;  %v457_v24 = vld [vmem:[%s1510_s2 + $0x18] sm:$0xff]  ;;  %v1150_v27 = vld [vmem:[%s1348_s13 + $0x30] sm:$0xff]   ;;  %v455_v30 = vld [vmem:[%s1510_s2 + $0x8] sm:$0xff] }
  0x2e   : > { %999 = vmatpush3.bf16.msra.mxu0 %v1138_v2  ;;  %1032 = vmatprep.subr.mxu1 %v466_v11  ;;  %v1151_v28 = vld [vmem:[%s1348_s13 + $0x38] sm:$0xff]   ;;  %v456_v29 = vld [vmem:[%s1510_s2 + $0x10] sm:$0xff]  ;;  %v454_v31 = vld [vmem:[%s1510_s2] sm:$0xff]  ;;  %s205_s13 = sand.u32 1, %s1234_s16  }
  0x2f   : > { %1000 = vmatprep.subr.bf16.mxu0 %v1139_v3  ;;  %1033 = vmatpush3.msra.mxu1 %v466_v11  ;;  %s840_s22 = sshll.u32 %s205_s13, 6  ;;  %s1430_s6 = scalar_lea.sflag [#allocation4], %s205_s13 }
  0x30   : > { %1034 = vmatprep.subr.mxu1 %v465_v12  ;;  %s1409_s23 = scalar_lea.vmem [#allocation5], %s840_s22 }
  0x31   : > { %1035 = vmatpush3.msra.mxu1 %v465_v12  ;;  %s731_s27 = sshll.u32 %s1409_s23, 4  ;;  %s1420_s27 = int_to_ptr.vmem [resolvable:$true] %s731_s27 }
  0x32   : > { %1001 = vmatpush3.bf16.msra.mxu0 %v1139_v3  ;;  %1036 = vmatprep.subr.mxu1 %v464_v14  ;;  %s1178_s7 = scalar_lea.vmem %s1420_s27, 1024  ;;  %p1185_p11 = scmp.lt.s32.totalorder %s1420_s27, %s1183_s10 }
  0x33   : > { %1002 = vmatprep.subr.bf16.mxu0 %v1140_v5  ;;  %1037 = vmatpush3.msra.mxu1 %v464_v14  ;;  %p1179_p6 = scmp.ne.s32.totalorder %s1420_s27, %s1178_s7  ;;  %p1186_p12 = scmp.lt.s32.totalorder %s1184_s11, %s1178_s7 }
  0x34   : > { %1038 = vmatprep.subr.mxu1 %v463_v15 }
  0x35   : > { %1039 = vmatpush3.msra.mxu1 %v463_v15  ;;  %p1180_p9 = pnand %p1179_p6, %p1313_p5  ;;  %p1187_p13 = por %p1186_p12, %p1185_p11 }
  0x36   : > { %1003 = vmatpush3.bf16.msra.mxu0 %v1140_v5  ;;  %1040 = vmatprep.subr.mxu1 %v462_v16 }
  0x37   : > { %1004 = vmatprep.subr.bf16.mxu0 %v1141_v6  ;;  %1041 = vmatpush3.msra.mxu1 %v462_v16  ;;  %p1181_p10 = pneg %p1180_p9 }
  0x38   : > { %1042 = vmatprep.subr.mxu1 %v461_v18 }
  0x39   : > { %1043 = vmatpush3.msra.mxu1 %v461_v18  ;;  %p1188_p0 = pnand %p1187_p13, %p1181_p10 }
  0x3a   : > { %1005 = vmatpush3.bf16.msra.mxu0 %v1141_v6  ;;  %1044 = vmatprep.subr.mxu1 %v460_v20 }
  0x3b   : > { %1006 = vmatprep.subr.bf16.mxu0 %v1142_v10  ;;  %1045 = vmatpush3.msra.mxu1 %v460_v20 }
  0x3c   : > { %1046 = vmatprep.subr.mxu1 %v459_v21 }
  0x3d   : > { %1047 = vmatpush3.msra.mxu1 %v459_v21 }
  0x3e   : > { %1007 = vmatpush3.bf16.msra.mxu0 %v1142_v10  ;;  %1048 = vmatprep.subr.mxu1 %v458_v22 }
  0x3f   : > { %1008 = vmatprep.subr.bf16.mxu0 %v1143_v13  ;;  %1049 = vmatpush3.msra.mxu1 %v458_v22 }
  0x40   : > { %1050 = vmatprep.subr.mxu1 %v457_v24 }
  0x41   : > { %1051 = vmatpush3.msra.mxu1 %v457_v24 }
  0x42   : > { %1009 = vmatpush3.bf16.msra.mxu0 %v1143_v13  ;;  %1052 = vmatprep.subr.mxu1 %v456_v29 }
  0x43   : > { %1053 = vmatpush3.msra.mxu1 %v456_v29 }
  0x44   : > { %1054 = vmatprep.subr.mxu1 %v455_v30 }
  0x45   : > { %1011 = vmatmul.mubr.bf16.vlgmr.msra.gmra.mxu0 %v1145_v17  ;;  %1055 = vmatpush3.msra.mxu1 %v455_v30 }
  0x46   : > { %1014 = vmatprep.mubr.bf16.mxu0 %v1146_v19  ;;  %1056 = vmatprep.subr.mxu1 %v454_v31 }
  0x47   : > { %1057 = vmatpush3.msra.mxu1 %v454_v31 }
  0x4d   : > { %1015 = vmatmul.mubr.bf16.gmra.mxu0 %v1147_v23 }
  0x4e   : > { %1018 = vmatprep.mubr.bf16.mxu0 %v1148_v25 }
  0x55   : > { %1019 = vmatmul.mubr.bf16.gmra.mxu0 %v1149_v26 }
  0x56   : > { %1022 = vmatprep.mubr.bf16.mxu0 %v1150_v27 }
  0x5d   : > { %1023 = vmatmul.mubr.bf16.gmra.mxu0 %v1151_v28 }
 0x105   : > { %v1012_v32 = vpop.f32.mrf.mxu0 }
 0x107   : > { %v391_v33 = vpop.f32.mrf.mxu0 }
 0x108   : > { %1058 = vmatprep.mubr.f32.mxu1 %v391_v33 }
 0x109   : > { %v1013_v34 = vpop.f32.mrf.mxu0 }
 0x10a   : > { %v907_v35 = vpack.c.bf16 %v1013_v34, %v1012_v32 }
 0x10b   : > { %v394_v36 = vpop.f32.mrf.mxu0 }
 0x10c   : > { %939 = vst [vmem:[%s1409_s23 + $0x8] sm:$0xff] %v907_v35   ;;  %v902_v37 = vpack.c.bf16 %v394_v36, %v391_v33  ;;  %1059 = vmatmul.mubr.f32.vlgmr.msra.gmra.mxu1 %v394_v36 }
 0x10d   : > { %v1016_v38 = vpop.f32.mrf.mxu0  ;;  %1061 = vmatprep.mubr.f32.mxu1 %v1012_v32 }
 0x10e   : > { %903 = vst [vmem:[%s1409_s23] sm:$0xff] %v902_v37  }
 0x10f   : > { %v407_v39 = vpop.f32.mrf.mxu0 }
 0x110   : > { %1062 = vmatmul.mubr.f32.gmra.mxu1 %v1013_v34 }
 0x111   : > { %v1017_v40 = vpop.f32.mrf.mxu0  ;;  %1064 = vmatprep.mubr.f32.mxu1 %v407_v39 }
 0x112   : > { %v917_v41 = vpack.c.bf16 %v1017_v40, %v1016_v38 }
 0x113   : > { %v410_v42 = vpop.f32.mrf.mxu0 }
 0x114   : > { %941 = vst [vmem:[%s1409_s23 + $0x18] sm:$0xff] %v917_v41   ;;  %v912_v43 = vpack.c.bf16 %v410_v42, %v407_v39  ;;  %1065 = vmatmul.mubr.f32.gmra.mxu1 %v410_v42 }
 0x115   : > { %v1020_v44 = vpop.f32.mrf.mxu0  ;;  %1067 = vmatprep.mubr.f32.mxu1 %v1016_v38 }
 0x116   : > { %940 = vst [vmem:[%s1409_s23 + $0x10] sm:$0xff] %v912_v43  }
 0x117   : > { %v423_v45 = vpop.f32.mrf.mxu0 }
 0x118   : > { %1068 = vmatmul.mubr.f32.gmra.mxu1 %v1017_v40 }
 0x119   : > { %v1021_v46 = vpop.f32.mrf.mxu0  ;;  %1070 = vmatprep.mubr.f32.mxu1 %v423_v45 }
 0x11a   : > { %v927_v47 = vpack.c.bf16 %v1021_v46, %v1020_v44 }
 0x11b   : > { %v426_v48 = vpop.f32.mrf.mxu0 }
 0x11c   : > { %943 = vst [vmem:[%s1409_s23 + $0x28] sm:$0xff] %v927_v47   ;;  %v922_v49 = vpack.c.bf16 %v426_v48, %v423_v45  ;;  %1071 = vmatmul.mubr.f32.gmra.mxu1 %v426_v48 }
 0x11d   : > { %v1024_v50 = vpop.f32.mrf.mxu0  ;;  %1073 = vmatprep.mubr.f32.mxu1 %v1020_v44 }
 0x11e   : > { %942 = vst [vmem:[%s1409_s23 + $0x20] sm:$0xff] %v922_v49  }
 0x11f   : > { %v439_v51 = vpop.f32.mrf.mxu0 }
 0x120   : > { %1074 = vmatmul.mubr.f32.gmra.mxu1 %v1021_v46 }
 0x121   : > { %v1025_v52 = vpop.f32.mrf.mxu0  ;;  %1076 = vmatprep.mubr.f32.mxu1 %v439_v51 }
 0x122   : > { %v937_v53 = vpack.c.bf16 %v1025_v52, %v1024_v50 }
 0x123   : > { %v442_v54 = vpop.f32.mrf.mxu0 }
 0x124   : > { %945 = vst [vmem:[%s1409_s23 + $0x38] sm:$0xff] %v937_v53   ;;  %v932_v55 = vpack.c.bf16 %v442_v54, %v439_v51  ;;  %1077 = vmatmul.mubr.f32.gmra.mxu1 %v442_v54 }
 0x125   : > { %1079 = vmatprep.mubr.f32.mxu1 %v1024_v50 }
 0x126   : > { %944 = vst [vmem:[%s1409_s23 + $0x30] sm:$0xff] %v932_v55  }
 0x128   : > { %1080 = vmatmul.mubr.f32.gmra.mxu1 %v1025_v52 }
 0x129   : > { %1191 = shalt.err (!%p1188_p0)
}
 0x12a   : > { %s1192_s19 = scalar_lea.hbm %s1426_s5, 1024  ;;  %s1196_s20 = scalar_lea.hbm %s1511_s3, 2048 }
 0x12b   : > { %p1193_p1 = scmp.ne.s32.totalorder %s1426_s5, %s1192_s19  ;;  %p1197_p4 = scmp.lt.s32.totalorder %s1426_s5, %s1511_s3 }
 0x12c   : > { %p1198_p7 = scmp.lt.s32.totalorder %s1196_s20, %s1192_s19 }
 0x12d   : > { %p1194_p2 = pnand %p1193_p1, %p1313_p5 }
 0x12e   : > { %p1199_p8 = por %p1198_p7, %p1197_p4 }
 0x12f   : > { %p1195_p3 = pneg %p1194_p2 }
 0x131   : > { %p1200_p6 = pnand %p1199_p8, %p1195_p3 }
 0x133   : > { %1203 = shalt.err (!%p1200_p6)
}
 0x134   : > { %s1248_s23 = smov 64   ;;  %s1249_s28 = smov 4   ;;  %vm615_vm0 = vcmask 15360  }
 0x135   : > { %1086 = dma.vmem_to_hbm [thread:$0]  (%p1313_p5), %s1420_s27, 1024, %s1426_s5, %s1430_s6, %s1248_s23, %s1248_s23, %s1249_s28  }
 0x136   : > { %s844_s29 = sshll.u32 %s1522_s9, 3 }
 0x137   : > { %s1457_s8 = scalar_lea.vmem %s1512_s4, %s844_s29 }
 0x1cc   : > { %v1060_v56 = vpop.f32.mrf.mxu1 }
 0x1cd   : > { %617 = vst.msk [vmem:[%s1457_s8 + $0x8] sm:$0xff] %vm615_vm0, %v1060_v56 }
 0x1ce   : > { %v536_v57 = vpop.f32.mrf.mxu1 }
 0x1cf   : > { %616 = vst.msk [vmem:[%s1457_s8] sm:$0xff] %vm615_vm0, %v536_v57 }
 0x1d0   : > { %v1063_v58 = vpop.f32.mrf.mxu1 }
 0x1d1   : > { %619 = vst.msk [vmem:[%s1457_s8 + $0x18] sm:$0xff] %vm615_vm0, %v1063_v58 }
 0x1d2   : > { %v546_v59 = vpop.f32.mrf.mxu1 }
 0x1d3   : > { %618 = vst.msk [vmem:[%s1457_s8 + $0x10] sm:$0xff] %vm615_vm0, %v546_v59 }
 0x1d4   : > { %v1066_v60 = vpop.f32.mrf.mxu1 }
 0x1d5   : > { %621 = vst.msk [vmem:[%s1457_s8 + $0x28] sm:$0xff] %vm615_vm0, %v1066_v60 }
 0x1d6   : > { %v556_v61 = vpop.f32.mrf.mxu1 }
 0x1d7   : > { %620 = vst.msk [vmem:[%s1457_s8 + $0x20] sm:$0xff] %vm615_vm0, %v556_v61 }
 0x1d8   : > { %v1069_v62 = vpop.f32.mrf.mxu1 }
 0x1d9   : > { %623 = vst.msk [vmem:[%s1457_s8 + $0x38] sm:$0xff] %vm615_vm0, %v1069_v62 }
 0x1da   : > { %v566_v63 = vpop.f32.mrf.mxu1 }
 0x1db   : > { %622 = vst.msk [vmem:[%s1457_s8 + $0x30] sm:$0xff] %vm615_vm0, %v566_v63 }
 0x1dc   : > { %v1072_v0 = vpop.f32.mrf.mxu1 }
 0x1dd   : > { %625 = vst.msk [vmem:[%s1457_s8 + $0x48] sm:$0xff] %vm615_vm0, %v1072_v0 }
 0x1de   : > { %v576_v1 = vpop.f32.mrf.mxu1 }
 0x1df   : > { %624 = vst.msk [vmem:[%s1457_s8 + $0x40] sm:$0xff] %vm615_vm0, %v576_v1 }
 0x1e0   : > { %v1075_v2 = vpop.f32.mrf.mxu1 }
 0x1e1   : > { %627 = vst.msk [vmem:[%s1457_s8 + $0x58] sm:$0xff] %vm615_vm0, %v1075_v2 }
 0x1e2   : > { %v586_v3 = vpop.f32.mrf.mxu1 }
 0x1e3   : > { %626 = vst.msk [vmem:[%s1457_s8 + $0x50] sm:$0xff] %vm615_vm0, %v586_v3 }
 0x1e4   : > { %v1078_v4 = vpop.f32.mrf.mxu1 }
 0x1e5   : > { %629 = vst.msk [vmem:[%s1457_s8 + $0x68] sm:$0xff] %vm615_vm0, %v1078_v4 }
 0x1e6   : > { %v596_v5 = vpop.f32.mrf.mxu1 }
 0x1e7   : > { %628 = vst.msk [vmem:[%s1457_s8 + $0x60] sm:$0xff] %vm615_vm0, %v596_v5 }
 0x1e8   : > { %v1081_v6 = vpop.f32.mrf.mxu1 }
 0x1e9   : > { %631 = vst.msk [vmem:[%s1457_s8 + $0x78] sm:$0xff] %vm615_vm0, %v1081_v6 }
 0x1ea   : > { %v606_v7 = vpop.f32.mrf.mxu1 }
 0x1eb   : > { %630 = vst.msk [vmem:[%s1457_s8 + $0x70] sm:$0xff] %vm615_vm0, %v606_v7 }
 0x1ec PF: > { %p1098_p5 = scmp.ge.s32.totalorder %s1242_s18, 2  ;;  %s750_s25 = sand.u32 1, %s1230_s15  }
 0x1ed   : > { %p1516_p9 = scmp.ne.s32.totalorder %s1514_s26, 0  ;;  %s751_s9 = scalar_lea.sflag [#allocation4], %s750_s25 }
 0x1ef   : > { %p1093_p10 = pnand %p1098_p5, %p1516_p9 }
 0x1f1   : > { %p1094_p11 = pneg %p1093_p10 }
 0x1f3   : > { %1225 = dma.done.wait (%p1094_p11), %s751_s9, 1024  }
 0x1f4   : > { %1227 = vsyncadd (%p1094_p11), %s751_s9, 4294966272  ;;  %p16_p12 = scmp.ge.s32.totalorder %s1300_s21, 4   ;;  %s1517_s15 = smov %s1234_s16 }
 0x1f5   : > { %s1518_s16 = smov %s1238_s17  ;;  %s1519_s17 = smov %s1311_s24 }
 0x1f6   : > { %s1520_s18 = smov %s1300_s21  ;;  %18 = sbr.rel (!%p16_p12) target bundleno = 4 (0x4), region = 84 }
 0x1fb   :  { %764 = vsyncpa [#allocation3], 1 }
 0x1fc   :  { %766 = vsyncpa [#allocation3 + $0x1], 1 }
 0x1fd   :  { %767 = vsyncpa [#allocation4], 1 }
 0x1fe   :  { %769 = vsyncpa [#allocation4 + $0x1], 1 }

</bundles_post_ra>
